<compile_context>
chip_gen: v5e
topology: v5e:2x2
jax: 0.10.0
libtpu: 0.0.40
codegen_flags: <defaults>
</compile_context>

<pallas_src>
import jax
import jax.numpy as jnp
from jax.experimental import pallas as pl
from jax.experimental.pallas import tpu as pltpu


_MIN_GRID_STEPS = 4          # >=2 needed for pipelining; 4 so each v7x core double-buffers
_SUBLANE = 8                 # row granule


def _dyn_stats_scaling_kernel(x_ref, inv_thr_ref, o_ref):
    # x_ref:       (TR, H) VMEM tile of the (viewed) activations, native dtype
    # inv_thr_ref: (1,)    SMEM f32 precomputed 1/threshold
    # o_ref:       (TR, 1) VMEM f32 per-row dynamic scale
    x = x_ref[...]
    # scaling_stats_impl == AbsMax over the per-row group (last dim).
    stats = jnp.max(jnp.abs(x), axis=-1, keepdims=True)            # (TR, 1)
    # Finish in f32; multiply by the precomputed reciprocal (no vector divide).
    o_ref[...] = stats.astype(jnp.float32) * inv_thr_ref[0]


def _round_up(v, m):
    return ((v + m - 1) // m) * m


def _vmem_capacity_bytes():
    """Physical VMEM of the current generation; conservative fallback (v7x per-TC)."""
    try:
        return int(pltpu.get_tpu_info().vmem_capacity_bytes)
    except Exception:
        return 64 * 1024 * 1024


def _choose_tiling(n_rows, hidden, itemsize):
    """Pick (row_tile, vmem_limit_bytes) for this generation / problem size."""
    capacity = _vmem_capacity_bytes()

    # Per-buffer x budget: big tiles on 128 MiB parts (v5e/v6e), capped on 64 MiB v7x.
    if capacity >= 128 * 1024 * 1024:
        per_buffer_budget = 28 * 1024 * 1024
    else:
        per_buffer_budget = 12 * 1024 * 1024

    row_bytes = max(1, hidden * itemsize)
    tr = per_buffer_budget // row_bytes                    # VMEM-fit bound (no row cap)
    tr = max(_SUBLANE, (int(tr) // _SUBLANE) * _SUBLANE)

    # Guarantee >= _MIN_GRID_STEPS grid steps whenever the row count allows, so
    # DMA/compute overlap and megacore sharding always engage.
    steps_cap = _round_up(pl.cdiv(n_rows, _MIN_GRID_STEPS), _SUBLANE)
    tr = min(tr, max(_SUBLANE, steps_cap))

    # Never exceed the (rounded-up) row count.
    rows_up = _round_up(n_rows, _SUBLANE)
    tr = max(_SUBLANE, min(tr, rows_up))

    # Derive the scoped-VMEM limit from the actual slab: double-buffered x tile
    # + double-buffered (TR, 1) f32 output + slack, capped below physical VMEM.
    slab = 2 * tr * row_bytes + 2 * tr * 4
    limit = max(slab + 4 * 1024 * 1024, 32 * 1024 * 1024)  # above v5e's 16 MiB default
    limit = min(limit, capacity - 8 * 1024 * 1024)         # <=56 MiB on v7x, <=120 MiB else
    return tr, int(limit)


def runtime_dynamic_stats_scaling(x, threshold=1.0):
    """Forward of RuntimeDynamicStatsScaling.

    x:         (..., H) activations (any float dtype; fed to the kernel natively)
    threshold: scalar
    returns:   (..., 1) f32 per-row dynamic scale, broadcastable against x
    """
    *lead, H = x.shape
    R = 1
    for d in lead:
        R *= d

    x2 = x.reshape(R, H)                                   # free view, native dtype
    inv_thr = (1.0 / jnp.asarray(threshold, jnp.float32)).reshape(1)

    TR, vmem_limit = _choose_tiling(R, H, x2.dtype.itemsize)
    grid = (pl.cdiv(R, TR),)

    out = pl.pallas_call(
        _dyn_stats_scaling_kernel,
        out_shape=jax.ShapeDtypeStruct((R, 1), jnp.float32),
        grid=grid,
        in_specs=[
            pl.BlockSpec((TR, H), lambda i: (i, 0)),       # row-tiled x, auto double-buffered
            pl.BlockSpec(memory_space=pltpu.SMEM),         # 1/threshold scalar
        ],
        out_specs=pl.BlockSpec((TR, 1), lambda i: (i, 0)),
        compiler_params=pltpu.CompilerParams(
            dimension_semantics=("parallel",),             # rows independent -> megacore
            vmem_limit_bytes=vmem_limit,                   # derived per-generation
        ),
    )(x2, inv_thr)

    # dynamic_scaling_broadcastable_fn: (..., 1), broadcastable against original x
    return out.reshape(*lead, 1)


if __name__ == "__main__":
    key = jax.random.PRNGKey(0)
    kx, ky = jax.random.split(key)

    # (B, T, H): per-token dynamic scaling over the hidden dim.
    B, T, H = 2, 8, 32
    x = jax.random.normal(kx, (B, T, H), dtype=jnp.float32)
    threshold = 2.5

    scale = jax.block_until_ready(runtime_dynamic_stats_scaling(x, threshold))

    ref = jnp.max(jnp.abs(x), axis=-1, keepdims=True) / threshold
    assert scale.shape == (B, T, 1)
    assert jnp.allclose(scale, ref, atol=1e-6, rtol=1e-6), (scale, ref)

    # Second check: native bf16 input + row count not a multiple of the 8-row
    # sublane granule (exercises the masked writeback of the padded tail rows
    # and the >=2-step grid clamp at tiny row counts).
    B2, T2, H2 = 2, 7, 32
    x_bf16 = jax.random.normal(ky, (B2, T2, H2), dtype=jnp.float32).astype(jnp.bfloat16)
    scale2 = jax.block_until_ready(runtime_dynamic_stats_scaling(x_bf16, 1.0))
    ref2 = jnp.max(jnp.abs(x_bf16).astype(jnp.float32), axis=-1, keepdims=True)
    assert scale2.shape == (B2, T2, 1)
    assert jnp.allclose(scale2, ref2, atol=1e-6, rtol=1e-6), (scale2, ref2)

    print("KERNEL_OK")
</pallas_src>

<mosaic_0001>
module attributes {stable_mosaic.version = 11 : i64} {
  func.func @_dyn_stats_scaling_kernel(%arg0: i32, %arg1: memref<8x32xf32, #tpu.memory_space<vmem>>, %arg2: memref<1xf32, #tpu.memory_space<smem>>, %arg3: memref<8x1xf32, #tpu.memory_space<vmem>>) attributes {dimension_semantics = [#tpu.dimension_semantics<parallel>], iteration_bounds = array<i64: 2>, scalar_prefetch = 0 : i64, scratch_operands = 0 : i64, tpu.core_type = #tpu.core_type<tc>, window_params = [{transform_indices = @transform_0, window_bounds = array<i64: 8, 32>}, {transform_indices = @transform_1, window_bounds = array<i64: 1>}, {transform_indices = @transform_2, window_bounds = array<i64: 8, 1>}]} {
    %c0 = arith.constant 0 : index
    %c0_0 = arith.constant 0 : index
    %0 = vector.load %arg1[%c0, %c0_0] : memref<8x32xf32, #tpu.memory_space<vmem>>, vector<8x32xf32>
    %1 = math.absf %0 : vector<8x32xf32>
    %cst = arith.constant dense<0xFF800000> : vector<8xf32>
    %2 = vector.multi_reduction <maximumf>, %1, %cst [1] : vector<8x32xf32> to vector<8xf32>
    %3 = vector.shape_cast %2 : vector<8xf32> to vector<8x1xf32>
    %c0_1 = arith.constant 0 : index
    %4 = memref.load %arg2[%c0_1] : memref<1xf32, #tpu.memory_space<smem>>
    %5 = vector.broadcast %4 : f32 to vector<8x1xf32>
    %6 = arith.mulf %3, %5 : vector<8x1xf32>
    %c0_2 = arith.constant 0 : index
    %c0_3 = arith.constant 0 : index
    %7 = vector.load %arg3[%c0_2, %c0_3] : memref<8x1xf32, #tpu.memory_space<vmem>>, vector<8x1xf32>
    tpu.vector_store %arg3[%c0_2, %c0_3], %6 {strides = array<i32>} : memref<8x1xf32, #tpu.memory_space<vmem>>, vector<8x1xf32>,
    return
  }
  func.func @transform_0(%arg0: i32) -> (i32, i32) {
    %c0_i32 = arith.constant 0 : i32
    %c0_i32_0 = arith.constant 0 : i32
    return %arg0, %c0_i32 : i32, i32
  }
  func.func @transform_1(%arg0: i32) -> i32 {
    %c0_i32 = arith.constant 0 : i32
    %c0_i32_0 = arith.constant 0 : i32
    return %c0_i32 : i32
  }
  func.func @transform_2(%arg0: i32) -> (i32, i32) {
    %c0_i32 = arith.constant 0 : i32
    %c0_i32_0 = arith.constant 0 : i32
    return %arg0, %c0_i32 : i32, i32
  }
}

</mosaic_0001>

<bundles_post_ra>
// kernel: tpu_custom_call.1
= control target key start
LH: loop header
LB: loop body
LE: loop exit
PB: predicated region body
PF: predicated region fallthrough
CT: control target
= control target key end

     0   :  { %s465_s0 = inlined_call_operand.hbm [shape: f32[16,32], index: 0, kind: input, shape index: {}]   ;;  %s466_s1 = inlined_call_operand.<no memory space> [shape: f32[1], index: 1, kind: input, shape index: {}]   ;;  %s467_s2 = inlined_call_operand.vmem [shape: f32[16,1], index: 2, kind: output, shape index: {}]  }
   0x1   :  { %7 = sst [smem:[#allocation2]] %s466_s1 }
   0x2   :  { %8 = vsyncpa [#allocation4], 0 }
   0x3   :  { %10 = vsyncpa [#allocation4 + $0x1], 0  ;;  %s371_s11 = smov 0   ;;  %s373_s12 = smov 0  }
   0x4   :  { %s375_s13 = smov 0   ;;  %s377_s14 = smov 0  }
   0x5 LB: > { %s390_s1 = sadd.s32 4294967295, %s351_s14   ;;  %s393_s15 = sadd.s32 1, %s351_s14   ;;  %s351_s14 = sphi %s377_s14, %s474_s14   ;;  %s347_s13 = sphi %s375_s13, %s473_s13   ;;  %s343_s12 = sphi %s373_s12, %s472_s12   ;;  %s339_s11 = sphi %s371_s11, %s471_s11  }
   0x6   : > { %s20_s16 = ssub.s32 %s351_s14, %s393_s15  ;;  %s23_s17 = sadd.s32 1, %s347_s13 }
   0x7   : > { %p21_p0 = scmp.eq.s32.totalorder %s20_s16, 0  ;;  %p30_p1 = scmp.ne.s32.totalorder %s347_s13, %s343_s12 }
   0x8   : > { %p31_p2 = scmp.eq.s32.totalorder %s351_s14, 0  ;;  %p36_p3 = scmp.ne.s32.totalorder %s343_s12, %s339_s11 }
   0x9   : > { %s403_s18 = scalar_select %p21_p0, %s347_s13, %s23_s17  }
   0xa   : > { %p405_p4 = por %p31_p2, %p30_p1  ;;  %p37_p5 = scmp.eq.s32.totalorder %s390_s1, 0 }
   0xb   : > { %p254_p6 = scmp.lt.s32.totalorder %s351_s14, 2  ;;  %s110_s21 = sand.u32 1, %s347_s13  }
   0xc   : > { %p411_p7 = por %p37_p5, %p36_p3  ;;  %s241_s22 = sshll.u32 %s110_s21, 3 }
   0xd   : > { %s242_s23 = sshll.u32 %s351_s14, 3  ;;  %s114_s27 = scalar_lea.vmem [#allocation3], %s241_s22 }
   0xe   : > { %s118_s26 = scalar_lea.hbm %s465_s0, %s242_s23  ;;  %s122_s28 = sshll.u32 %s114_s27, 4  ;;  %s123_s28 = int_to_ptr.vmem [resolvable:$true] %s122_s28 }
   0xf   : > { %s120_s29 = sshll.u32 %s118_s26, 4  ;;  %p422_p8 = pnand %p254_p6, %p405_p4  ;;  %s121_s29 = int_to_ptr.hbm [resolvable:$true] %s120_s29 }
  0x10   : > { %p243_p9 = scmp.ge.s32.totalorder %s351_s14, 1  ;;  %p127_p10 = scmp.lt.s32.totalorder %s351_s14, 3 }
  0x11   : > { %s111_s3 = scalar_lea.sflag [#allocation4], %s110_s21  ;;  %s287_s4 = sshra.s32 %s121_s29, 4  ;;  %s288_s4 = int_to_ptr.hbm [resolvable:$true] %s287_s4 }
  0x12   : > { %s289_s5 = scalar_lea.hbm %s288_s4, 8  ;;  %p291_p12 = pneg %p422_p8 }
  0x13   : > { %p290_p11 = scmp.ne.s32.totalorder %s288_s4, %s289_s5  ;;  %s294_s8 = scalar_lea.hbm %s465_s0, 16 }
  0x14   : > { %p295_p1 = scmp.lt.s32.totalorder %s288_s4, %s465_s0  ;;  %p296_p2 = scmp.lt.s32.totalorder %s294_s8, %s289_s5 }
  0x15   : > { %p292_p13 = pnand %p291_p12, %p290_p11 }
  0x16   : > { %p297_p3 = por %p296_p2, %p295_p1 }
  0x17   : > { %p293_p0 = pneg %p292_p13 }
  0x19   : > { %p298_p4 = pnand %p297_p3, %p293_p0 }
  0x1b   : > { %301 = shalt.err (!%p298_p4)
}
  0x1c   : > { %253 = dma.hbm_to_vmem [thread:$0]  (!%p422_p8), %s121_s29, 128, %s123_s28, %s111_s3  }
  0x1d   : > { %p128_p5 = pnand %p243_p9, %p127_p10 }
  0x1e   : > { %s133_s11 = sand.u32 (!%p128_p5), 1, %s343_s12  }
  0x1f   : > { %131 = sbr.rel (%p128_p5) target bundleno = 160 (0xa0), region = 28  ;;  %s244_s16 = sshll.u32 (!%p128_p5), %s133_s11, 3 }
  0x20   : > { %s134_s17 = scalar_lea.sflag (!%p128_p5), [#allocation4], %s133_s11  ;;  %s137_s19 = scalar_lea.vmem (!%p128_p5), [#allocation3], %s244_s16 }
  0x24   : > { %334 = dma.done.wait (%p411_p7), %s134_s17, 128  }
  0x25   : > { %336 = vsyncadd (%p411_p7), %s134_s17, 4294967168  ;;  %v162_v0 = vld [vmem:[%s137_s19] sm:$0xff]  ;;  %vm164_vm0 = vcmask 261120   ;;  %p158_p6 = scmp.lt.s32.totalorder %s390_s1, 1  ;;  %s168_s14 = sld [smem:[#allocation2]]  ;;  %vm171_vm1 = vcmask 7168  }
  0x26   : > { %v163_v1 = vand.u32 2147483647, %v162_v0 }
  0x27   : > { %s476_s1 = smov (!%p158_p6, %s390_s1), 1 }
  0x28   : > { %v165_v2 = vsel %vm164_vm0, %v163_v1, -inf  ;;  %s245_s21 = sshll.u32 %s476_s1, 3 }
  0x29   : > { %166 = vmax.xlane.f32.xlu0 %v165_v2  ;;  %s161_s24 = scalar_lea.vmem %s467_s2, %s245_s21 }
  0x2b   : > { %v169_v3 = vstv %s168_s14 }
  0x9c   : > { %v167_v4 = vpop.xlane.xlu0 %166 }
  0x9d   : > { %v170_v5 = vmul.f32 %v169_v3, %v167_v4 }
  0x9f   : > { %172 = vst.msk [vmem:[%s161_s24] sm:$0xff] %vm171_vm1, %v170_v5 }
  0xa0 PF: > { %p13_p7 = scmp.ge.s32.totalorder %s393_s15, 4   ;;  %s471_s11 = smov %s343_s12 }
  0xa1   : > { %s472_s12 = smov %s347_s13  ;;  %s473_s13 = smov %s403_s18 }
  0xa2   : > { %s474_s14 = smov %s393_s15  ;;  %15 = sbr.rel (!%p13_p7) target bundleno = 5 (0x5), region = 68 }
  0xa7   :  { %192 = vsyncpa [#allocation4], 1 }
  0xa8   :  { %194 = vsyncpa [#allocation4 + $0x1], 1 }

</bundles_post_ra>
